<compile_context>
chip_gen: v7x
topology: tpu7x:2x2x1
jax: 0.10.0
libtpu: 0.0.40
codegen_flags: <defaults>
</compile_context>

<pallas_src>
import functools

import jax
import jax.numpy as jnp
from jax import lax
from jax.experimental import pallas as pl
from jax.experimental.pallas import tpu as pltpu

GN_GROUPS = 32
GN_EPS = 1e-5
ACT_DTYPE = jnp.bfloat16               # inter-layer activations / MXU inputs
_VMEM_LIMIT = 48 * 1024 * 1024         # fits v7x's 64 MiB physical VMEM with headroom
_TILE_BYTES = 1 * 1024 * 1024          # target bytes for one bf16 input row tile


def _params(dims):
    return pltpu.CompilerParams(dimension_semantics=dims,
                                vmem_limit_bytes=_VMEM_LIMIT)


def _row_tile(H, W, C, itemsize=2):
    """Largest divisor of H whose (rows, W, C) tile stays under the byte target."""
    limit = max(1, _TILE_BYTES // max(1, W * C * itemsize))
    best = 1
    for d in range(1, H + 1):
        if H % d == 0 and d <= limit:
            best = d
    return best


# ---------------------------------------------------------------------------
# Pallas kernels
# ---------------------------------------------------------------------------
def _gn_stats_kernel(x_ref, sum_ref, ssq_ref):
    """Per-channel sum / sum-of-squares, accumulated over row tiles (f32)."""
    @pl.when(pl.program_id(1) == 0)
    def _():
        sum_ref[...] = jnp.zeros_like(sum_ref)
        ssq_ref[...] = jnp.zeros_like(ssq_ref)

    C = x_ref.shape[-1]
    xf = x_ref[0].astype(jnp.float32).reshape(-1, C)          # (th*W, C)
    sum_ref[0] = sum_ref[0] + jnp.sum(xf, axis=0, keepdims=True)
    ssq_ref[0] = ssq_ref[0] + jnp.sum(xf * xf, axis=0, keepdims=True)


def _conv3x3_kernel(*refs, act, skip):
    """Fused [GroupNorm-normalize + SiLU] -> 3x3 conv (stride 1) -> [+residual].

    Input block is a (th+2, W, Cin) row window with a 1-row halo (already
    gathered by the wrapper, rows clamped at the image edges); the kernel stages
    the activated tile into a VMEM scratch with zero column/row halos and runs
    the conv as 9 shifted MXU matmuls accumulating into an f32 VMEM scratch.
    """
    i = 0
    x_ref = refs[i]; i += 1
    if act:
        sc_ref, sh_ref = refs[i], refs[i + 1]; i += 2
    w_ref, b_ref = refs[i], refs[i + 1]; i += 2
    if skip == "add":
        s_ref = refs[i]; i += 1
    elif skip == "conv":
        s_ref, sw_ref, sb_ref = refs[i], refs[i + 1], refs[i + 2]; i += 3
    o_ref, a_buf, acc = refs[i], refs[i + 1], refs[i + 2]

    th = x_ref.shape[1] - 2
    W = x_ref.shape[2]
    cin = x_ref.shape[3]
    cout = o_ref.shape[3]
    t = pl.program_id(1)

    xv = x_ref[0]                                              # (th+2, W, cin) bf16
    if act:
        a = xv.astype(jnp.float32) * sc_ref[...] + sh_ref[...]
        a = a * (1.0 / (1.0 + jnp.exp(-a)))                    # SiLU in f32 (VPU/EUP)
        a = a.astype(a_buf.dtype)
    else:
        a = xv.astype(a_buf.dtype)

    # Stage activated tile in VMEM with zero column halos (conv padding in W).
    zc = jnp.zeros((th + 2, 1, cin), a_buf.dtype)
    a_buf[:, 0:1, :] = zc
    a_buf[:, W + 1:W + 2, :] = zc
    a_buf[:, 1:W + 1, :] = a

    # Zero the row halo where it falls outside the image (conv padding in H).
    zr = jnp.zeros((1, W + 2, cin), a_buf.dtype)

    @pl.when(t == 0)
    def _():
        a_buf[0:1, :, :] = zr

    @pl.when(t == pl.num_programs(1) - 1)
    def _():
        a_buf[th + 1:th + 2, :, :] = zr

    # 3x3 conv = 9 shifted matmuls on the MXU, f32 accumulation in VMEM scratch.
    acc[...] = jnp.zeros_like(acc)
    for k in range(9):
        dy, dx = divmod(k, 3)
        patch = a_buf[dy:dy + th, dx:dx + W, :].reshape(th * W, cin)
        acc[...] += jnp.dot(patch, w_ref[k], preferred_element_type=jnp.float32)

    y = acc[...] + b_ref[...]
    if skip == "add":
        y = y + s_ref[0].reshape(th * W, cout).astype(jnp.float32)
    elif skip == "conv":
        cs = s_ref.shape[3]
        y = y + (jnp.dot(s_ref[0].reshape(th * W, cs), sw_ref[...],
                         preferred_element_type=jnp.float32) + sb_ref[...])
    o_ref[0] = y.reshape(th, W, cout).astype(o_ref.dtype)


def _matmul_kernel(x_ref, w_ref, b_ref, o_ref):
    """Channel matmul (1x1 conv / im2col strided conv) on a row tile."""
    th, W, cin = x_ref.shape[1], x_ref.shape[2], x_ref.shape[3]
    cout = o_ref.shape[3]
    xf = x_ref[0].reshape(th * W, cin)
    y = jnp.dot(xf, w_ref[...], preferred_element_type=jnp.float32) + b_ref[...]
    o_ref[0] = y.reshape(th, W, cout).astype(o_ref.dtype)


def _plane_out_kernel(x_ref, w_ref, b_ref, o_ref):
    """Final 1-channel 1x1 conv, written lane-dense as a (th, W) plane."""
    xw = x_ref[0].astype(jnp.float32)                          # (th, W, cin)
    y = jnp.sum(xw * w_ref[...], axis=-1) + b_ref[...]         # (th, W) + (1,1)
    o_ref[0] = y


# ---------------------------------------------------------------------------
# Pallas wrappers (jit'd so identical shapes reuse compiled kernels)
# ---------------------------------------------------------------------------
def _row_windows(x, th):
    """(B,H,W,C) -> overlapping halo row tiles (B*nt, th+2, W, C) (edge-clamped)."""
    B, H, W, C = x.shape
    nt = H // th
    rows = jnp.arange(nt)[:, None] * th + jnp.arange(th + 2)[None, :] - 1
    rows = jnp.clip(rows, 0, H - 1)
    xt = x[:, rows]                                            # (B, nt, th+2, W, C)
    return xt.reshape(B * nt, th + 2, W, C)


@jax.jit
def gn_scale_shift(x, gamma, beta):
    """Two-pass GroupNorm: tiled Pallas stats kernel + tiny per-(B,C) affine."""
    B, H, W, C = x.shape
    cg = C // GN_GROUPS
    th = _row_tile(H, W, C)
    nt = H // th
    s, ss = pl.pallas_call(
        _gn_stats_kernel,
        out_shape=(jax.ShapeDtypeStruct((B, 1, C), jnp.float32),
                   jax.ShapeDtypeStruct((B, 1, C), jnp.float32)),
        grid=(B, nt),
        in_specs=[pl.BlockSpec((1, th, W, C), lambda b_, t_: (b_, t_, 0, 0))],
        out_specs=(pl.BlockSpec((1, 1, C), lambda b_, t_: (b_, 0, 0)),
                   pl.BlockSpec((1, 1, C), lambda b_, t_: (b_, 0, 0))),
        compiler_params=_params(("parallel", "arbitrary")),
    )(x)
    n = float(H * W * cg)
    mean_g = s.reshape(B, GN_GROUPS, cg).sum(-1) / n           # (B, G)
    msq_g = ss.reshape(B, GN_GROUPS, cg).sum(-1) / n
    var_g = jnp.maximum(msq_g - mean_g * mean_g, 0.0)          # clamp (no NaN rsqrt)
    inv_g = lax.rsqrt(var_g + GN_EPS)
    mean_c = jnp.repeat(mean_g, cg, axis=1)                    # (B, C)
    inv_c = jnp.repeat(inv_g, cg, axis=1)
    scale = gamma[None, :] * inv_c
    shift = beta[None, :] - mean_c * scale
    return scale[:, None, :], shift[:, None, :]                # (B, 1, C) each


@functools.partial(jax.jit, static_argnames=("act", "skip_mode"))
def conv3x3_fused(x, w, b, scale=None, shift=None, skip=None, skip_w=None,
                  skip_b=None, *, act, skip_mode="none"):
    """[norm+SiLU] -> 3x3 conv (stride 1, pad 1) -> [+residual], row-tiled."""
    B, H, W, Cin = x.shape
    Cout = w.shape[-1]
    th = _row_tile(H, W, Cin)
    nt = H // th
    xt = _row_windows(x, th)

    kern = functools.partial(_conv3x3_kernel, act=act, skip=skip_mode)
    in_specs = [pl.BlockSpec((1, th + 2, W, Cin),
                             lambda b_, t_: (b_ * nt + t_, 0, 0, 0))]
    args = [xt]
    if act:
        in_specs += [pl.BlockSpec((1, 1, Cin), lambda b_, t_: (b_, 0, 0)),
                     pl.BlockSpec((1, 1, Cin), lambda b_, t_: (b_, 0, 0))]
        args += [scale, shift]
    in_specs += [pl.BlockSpec((9, Cin, Cout), lambda b_, t_: (0, 0, 0)),
                 pl.BlockSpec((1, Cout), lambda b_, t_: (0, 0))]
    args += [w, b]
    if skip_mode == "add":
        in_specs += [pl.BlockSpec((1, th, W, Cout), lambda b_, t_: (b_, t_, 0, 0))]
        args += [skip]
    elif skip_mode == "conv":
        Cs = skip.shape[-1]
        in_specs += [pl.BlockSpec((1, th, W, Cs), lambda b_, t_: (b_, t_, 0, 0)),
                     pl.BlockSpec((Cs, Cout), lambda b_, t_: (0, 0)),
                     pl.BlockSpec((1, Cout), lambda b_, t_: (0, 0))]
        args += [skip, skip_w, skip_b]

    return pl.pallas_call(
        kern,
        out_shape=jax.ShapeDtypeStruct((B, H, W, Cout), ACT_DTYPE),
        grid=(B, nt),
        in_specs=in_specs,
        out_specs=pl.BlockSpec((1, th, W, Cout), lambda b_, t_: (b_, t_, 0, 0)),
        scratch_shapes=[pltpu.VMEM((th + 2, W + 2, Cin), ACT_DTYPE),
                        pltpu.VMEM((th * W, Cout), jnp.float32)],
        compiler_params=_params(("parallel", "parallel")),
    )(*args)


@jax.jit
def conv1x1(x, w, b):
    """x: (B,H,W,Cin) bf16; w: (Cin,Cout) bf16; b: (1,Cout) f32. Row-tiled matmul."""
    B, H, W, Cin = x.shape
    Cout = w.shape[-1]
    th = _row_tile(H, W, Cin)
    nt = H // th
    return pl.pallas_call(
        _matmul_kernel,
        out_shape=jax.ShapeDtypeStruct((B, H, W, Cout), ACT_DTYPE),
        grid=(B, nt),
        in_specs=[pl.BlockSpec((1, th, W, Cin), lambda b_, t_: (b_, t_, 0, 0)),
                  pl.BlockSpec((Cin, Cout), lambda b_, t_: (0, 0)),
                  pl.BlockSpec((1, Cout), lambda b_, t_: (0, 0))],
        out_specs=pl.BlockSpec((1, th, W, Cout), lambda b_, t_: (b_, t_, 0, 0)),
        compiler_params=_params(("parallel", "parallel")),
    )(x, w, b)


@functools.partial(jax.jit, static_argnames=("stride",))
def conv3x3_strided(x, w, b, *, stride):
    """Direct strided 3x3 conv (pad 1): 9-phase im2col + one matmul per tile.

    Only the needed output positions are computed (4x / 16x fewer FLOPs than a
    stride-1 conv followed by subsampling).
    """
    B, H, W, Cin = x.shape
    Cout = w.shape[-1]
    Ho, Wo = H // stride, W // stride
    xp = jnp.pad(x, ((0, 0), (1, 1), (1, 1), (0, 0)))
    taps = [lax.slice(xp, (0, dy, dx, 0),
                      (B, dy + stride * Ho, dx + stride * Wo, Cin),
                      (1, stride, stride, 1))
            for dy in range(3) for dx in range(3)]
    xi = jnp.concatenate(taps, axis=-1)                        # (B, Ho, Wo, 9*Cin)
    return conv1x1(xi, w.reshape(9 * Cin, Cout), b)


@jax.jit
def conv_out_plane(x, w, b):
    """Final 64->1 1x1 conv with a lane-dense (B, H, W) f32 output."""
    B, H, W, Cin = x.shape
    th = _row_tile(H, W, Cin)
    nt = H // th
    out = pl.pallas_call(
        _plane_out_kernel,
        out_shape=jax.ShapeDtypeStruct((B * nt, th, W), jnp.float32),
        grid=(B, nt),
        in_specs=[pl.BlockSpec((1, th, W, Cin), lambda b_, t_: (b_, t_, 0, 0)),
                  pl.BlockSpec((1, Cin), lambda b_, t_: (0, 0)),
                  pl.BlockSpec((1, 1), lambda b_, t_: (0, 0))],
        out_specs=pl.BlockSpec((1, th, W), lambda b_, t_: (b_ * nt + t_, 0, 0)),
        compiler_params=_params(("parallel", "parallel")),
    )(x, w, b)
    return out.reshape(B, H, W)


# ---------------------------------------------------------------------------
# Glue (layout only)
# ---------------------------------------------------------------------------
def upsample_nearest(x, out_h, out_w):
    # PyTorch nn.Upsample(mode="nearest"): src = floor(dst * in / out)
    _, H, W, _ = x.shape
    hi = (jnp.arange(out_h) * H) // out_h
    wi = (jnp.arange(out_w) * W) // out_w
    return x[:, hi][:, :, wi]


# ---------------------------------------------------------------------------
# Parameter construction (deterministic, synthetic)
# ---------------------------------------------------------------------------
def _init_conv3(key, cin, cout, scale=0.05):
    kw, kb = jax.random.split(key)
    w = scale * jax.random.normal(kw, (9, cin, cout), jnp.float32)
    b = scale * jax.random.normal(kb, (1, cout), jnp.float32)
    return {"w": w.astype(ACT_DTYPE), "b": b}


def _init_conv1(key, cin, cout, scale=0.05):
    kw, kb = jax.random.split(key)
    w = scale * jax.random.normal(kw, (cin, cout), jnp.float32)
    b = scale * jax.random.normal(kb, (1, cout), jnp.float32)
    return {"w": w.astype(ACT_DTYPE), "b": b}


def init_rb(key, cin, cout):
    k1, k2, k3 = jax.random.split(key, 3)
    return {
        "gn1_g": jnp.ones((cin,), jnp.float32),
        "gn1_b": jnp.zeros((cin,), jnp.float32),
        "conv1": _init_conv3(k1, cin, cout),
        "gn2_g": jnp.ones((cout,), jnp.float32),
        "gn2_b": jnp.zeros((cout,), jnp.float32),
        "conv2": _init_conv3(k2, cout, cout),
        "skip": _init_conv1(k3, cin, cout) if cin != cout else None,
    }


def rb_forward(p, x):
    sc1, sh1 = gn_scale_shift(x, p["gn1_g"], p["gn1_b"])
    h = conv3x3_fused(x, p["conv1"]["w"], p["conv1"]["b"],
                      scale=sc1, shift=sh1, act=True)
    sc2, sh2 = gn_scale_shift(h, p["gn2_g"], p["gn2_b"])
    if p["skip"] is None:
        return conv3x3_fused(h, p["conv2"]["w"], p["conv2"]["b"],
                             scale=sc2, shift=sh2, skip=x,
                             act=True, skip_mode="add")
    return conv3x3_fused(h, p["conv2"]["w"], p["conv2"]["b"],
                         scale=sc2, shift=sh2, skip=x,
                         skip_w=p["skip"]["w"], skip_b=p["skip"]["b"],
                         act=True, skip_mode="conv")


# ----------------------------- FCB (U-Net branch) ---------------------------
def init_fcb(key, in_channels=3, min_level_channels=32,
             min_channel_mults=(1, 1, 2, 2, 4, 4),
             n_levels_down=6, n_levels_up=6, n_RBs=2):
    ki = iter(jax.random.split(key, 64))
    enc = [("conv", _init_conv3(next(ki), in_channels, min_level_channels))]
    ch = min_level_channels
    enc_chans = [min_level_channels]
    for level in range(n_levels_down):
        mult = min_channel_mults[level]
        for _ in range(n_RBs):
            enc.append(("rb", init_rb(next(ki), ch, mult * min_level_channels)))
            ch = mult * min_level_channels
            enc_chans.append(ch)
        if level != n_levels_down - 1:
            enc.append(("down", _init_conv3(next(ki), ch, ch)))
            enc_chans.append(ch)
    middle = [init_rb(next(ki), ch, ch), init_rb(next(ki), ch, ch)]
    dec = []
    for level in range(n_levels_up):
        mult = min_channel_mults[::-1][level]
        for block in range(n_RBs + 1):
            rb = init_rb(next(ki), ch + enc_chans.pop(), mult * min_level_channels)
            ch = mult * min_level_channels
            up = None
            if level < n_levels_up - 1 and block == n_RBs:
                up = _init_conv3(next(ki), ch, ch)
            dec.append({"rb": rb, "up": up})
    return {"enc": enc, "middle": middle, "dec": dec}


def fcb_forward(p, x):
    hs = []
    h = x
    for kind, blk in p["enc"]:
        if kind == "conv":
            h = conv3x3_fused(h, blk["w"], blk["b"], act=False)
        elif kind == "rb":
            h = rb_forward(blk, h)
        else:  # "down": direct stride-2 conv
            h = conv3x3_strided(h, blk["w"], blk["b"], stride=2)
        hs.append(h)
    for blk in p["middle"]:
        h = rb_forward(blk, h)
    for blk in p["dec"]:
        h = rb_forward(blk["rb"], jnp.concatenate([h, hs.pop()], axis=-1))
        if blk["up"] is not None:
            _, H, W, _ = h.shape
            h = upsample_nearest(h, 2 * H, 2 * W)
            h = conv3x3_fused(h, blk["up"]["w"], blk["up"]["b"], act=False)
    return h


# ----------------------------- TB / PE (transformer branch) -----------------
def init_tb(key):
    # TODO(synk): the PVTv2-b3 backbone used by PE.get_pyramid (external pvt_v2
    # module + 'pvt_v2_b3.pth' checkpoint) has no in-script equivalent; the
    # feature pyramid is produced by strided conv patch-embeddings with the same
    # channel widths / strides [64@/4, 128@/8, 320@/16, 512@/32] instead.
    # TODO(synk): PE.__init__'s match-statement (nn.Conv2d(in_channels=1)) is
    # broken/dead code in the reference and does not affect the forward pass.
    embed_dims = [64, 128, 320, 512]
    strides = [4, 2, 2, 2]
    ki = iter(jax.random.split(key, 32))
    patch, cin = [], 3
    for d, s in zip(embed_dims, strides):
        patch.append((_init_conv3(next(ki), cin, d), s))
        cin = d
    le = [(init_rb(next(ki), d, 64), init_rb(next(ki), 64, 64)) for d in embed_dims]
    sfa = [(init_rb(next(ki), 128, 64), init_rb(next(ki), 64, 64)) for _ in range(3)]
    return {"patch": patch, "le": le, "sfa": sfa}


def tb_forward(p, x, size):
    """PE.forward: get_pyramid -> per-level LE -> SFA cascade."""
    pyramid, h = [], x
    for conv_p, stride in p["patch"]:
        h = conv3x3_strided(h, conv_p["w"], conv_p["b"], stride=stride)
        pyramid.append(h)
    emph = []
    for i in range(4):
        e = rb_forward(p["le"][i][0], pyramid[i])
        e = rb_forward(p["le"][i][1], e)
        # PyTorch hard-codes Upsample(size=88) == (train_res 352)//4 -> size//4 here.
        e = upsample_nearest(e, size // 4, size // 4)
        emph.append(e)
    l_i = emph[-1]
    for i in range(2, -1, -1):
        l = jnp.concatenate([emph[i], l_i], axis=-1)
        l = rb_forward(p["sfa"][i][0], l)
        l = rb_forward(p["sfa"][i][1], l)
        l_i = l
    return l_i


# ----------------------------- FCBFormer -----------------------------------
def init_fcbformer(key):
    k1, k2, k3, k4, k5 = jax.random.split(key, 5)
    kw, kb = jax.random.split(k5)
    return {
        "tb": init_tb(k1),
        "fcb": init_fcb(k2),
        "ph": [init_rb(k3, 64 + 32, 64), init_rb(k4, 64, 64)],
        "ph_out": {"w": 0.05 * jax.random.normal(kw, (1, 64), jnp.float32),
                   "b": 0.05 * jax.random.normal(kb, (1, 1), jnp.float32)},
    }


def fcbformer_forward(params, x_nchw, size):
    x = jnp.transpose(x_nchw, (0, 2, 3, 1)).astype(ACT_DTYPE)   # NCHW -> NHWC bf16
    x1 = tb_forward(params["tb"], x, size)                      # (B, size//4, size//4, 64)
    x2 = fcb_forward(params["fcb"], x)                          # (B, size, size, 32)
    x1 = upsample_nearest(x1, size, size)
    xc = jnp.concatenate([x1, x2], axis=-1)                     # 96 channels
    h = rb_forward(params["ph"][0], xc)
    h = rb_forward(params["ph"][1], h)
    out = conv_out_plane(h, params["ph_out"]["w"], params["ph_out"]["b"])  # (B,S,S) f32
    return out[:, None, :, :]                                   # (B, 1, S, S)


# ---------------------------------------------------------------------------
if __name__ == "__main__":
    SIZE = 32        # small synthetic resolution; must be divisible by 32 (5 downsamples)
    key = jax.random.PRNGKey(0)
    kp, kx = jax.random.split(key)
    params = init_fcbformer(kp)
    x = jax.random.normal(kx, (2, 3, SIZE, SIZE), jnp.float32)  # NCHW like PyTorch

    out = jax.block_until_ready(fcbformer_forward(params, x, SIZE))

    assert out.shape == (2, 1, SIZE, SIZE), out.shape
    assert bool(jnp.all(jnp.isfinite(out)))
    print("KERNEL_OK")
</pallas_src>

<mosaic_0001>
module attributes {stable_mosaic.version = 11 : i64} {
  func.func @_matmul_kernel(%arg0: i32, %arg1: i32, %arg2: memref<1x8x8x27xbf16, #tpu.memory_space<vmem>>, %arg3: memref<27x64xbf16, #tpu.memory_space<vmem>>, %arg4: memref<1x64xf32, #tpu.memory_space<vmem>>, %arg5: memref<1x8x8x64xbf16, #tpu.memory_space<vmem>>) attributes {dimension_semantics = [#tpu.dimension_semantics<parallel>, #tpu.dimension_semantics<parallel>], iteration_bounds = array<i64: 2, 1>, scalar_prefetch = 0 : i64, scratch_operands = 0 : i64, tpu.core_type = #tpu.core_type<tc>, window_params = [{transform_indices = @transform_0, window_bounds = array<i64: 1, 8, 8, 27>}, {pipeline_mode = #tpu.pipeline_mode<synchronous>, transform_indices = @transform_1, window_bounds = array<i64: 27, 64>}, {pipeline_mode = #tpu.pipeline_mode<synchronous>, transform_indices = @transform_2, window_bounds = array<i64: 1, 64>}, {transform_indices = @transform_3, window_bounds = array<i64: 1, 8, 8, 64>}]} {
    %c0 = arith.constant 0 : index
    %c0_0 = arith.constant 0 : index
    %c0_1 = arith.constant 0 : index
    %c0_2 = arith.constant 0 : index
    %0 = vector.load %arg2[%c0, %c0_0, %c0_1, %c0_2] : memref<1x8x8x27xbf16, #tpu.memory_space<vmem>>, vector<1x8x8x27xbf16>
    %1 = vector.shape_cast %0 : vector<1x8x8x27xbf16> to vector<8x8x27xbf16>
    %2 = vector.shape_cast %1 : vector<8x8x27xbf16> to vector<64x27xbf16>
    %c0_3 = arith.constant 0 : index
    %c0_4 = arith.constant 0 : index
    %3 = vector.load %arg3[%c0_3, %c0_4] : memref<27x64xbf16, #tpu.memory_space<vmem>>, vector<27x64xbf16>
    %cst = arith.constant dense<0.000000e+00> : vector<64x64xf32>
    %4 = tpu.matmul %2, %3, %cst {dimension_numbers = #tpu.dot_dimension_numbers<[1], [0], [0], [1], [0, 0, 1, 1], [], []>} : vector<64x27xbf16>, vector<27x64xbf16>, vector<64x64xf32> -> vector<64x64xf32>
    %c0_5 = arith.constant 0 : index
    %c0_6 = arith.constant 0 : index
    %5 = vector.load %arg4[%c0_5, %c0_6] : memref<1x64xf32, #tpu.memory_space<vmem>>, vector<1x64xf32>
    %6 = vector.broadcast %5 : vector<1x64xf32> to vector<64x64xf32>
    %7 = arith.addf %4, %6 : vector<64x64xf32>
    %8 = vector.shape_cast %7 : vector<64x64xf32> to vector<8x8x64xf32>
    %9 = arith.truncf %8 : vector<8x8x64xf32> to vector<8x8x64xbf16>
    %c0_7 = arith.constant 0 : index
    %c0_8 = arith.constant 0 : index
    %c0_9 = arith.constant 0 : index
    %c0_10 = arith.constant 0 : index
    %10 = vector.load %arg5[%c0_7, %c0_8, %c0_9, %c0_10] : memref<1x8x8x64xbf16, #tpu.memory_space<vmem>>, vector<1x8x8x64xbf16>
    %11 = vector.shape_cast %10 : vector<1x8x8x64xbf16> to vector<8x8x64xbf16>
    %12 = vector.shape_cast %9 : vector<8x8x64xbf16> to vector<1x8x8x64xbf16>
    tpu.vector_store %arg5[%c0_7, %c0_8, %c0_9, %c0_10], %12 {strides = array<i32>} : memref<1x8x8x64xbf16, #tpu.memory_space<vmem>>, vector<1x8x8x64xbf16>,
    return
  }
  func.func @transform_0(%arg0: i32, %arg1: i32) -> (i32, i32, i32, i32) {
    %c0_i32 = arith.constant 0 : i32
    %c0_i32_0 = arith.constant 0 : i32
    %c0_i32_1 = arith.constant 0 : i32
    return %arg0, %arg1, %c0_i32, %c0_i32_0 : i32, i32, i32, i32
  }
  func.func @transform_1(%arg0: i32, %arg1: i32) -> (i32, i32) {
    %c0_i32 = arith.constant 0 : i32
    %c0_i32_0 = arith.constant 0 : i32
    %c0_i32_1 = arith.constant 0 : i32
    return %c0_i32, %c0_i32_0 : i32, i32
  }
  func.func @transform_2(%arg0: i32, %arg1: i32) -> (i32, i32) {
    %c0_i32 = arith.constant 0 : i32
    %c0_i32_0 = arith.constant 0 : i32
    %c0_i32_1 = arith.constant 0 : i32
    return %c0_i32, %c0_i32_0 : i32, i32
  }
  func.func @transform_3(%arg0: i32, %arg1: i32) -> (i32, i32, i32, i32) {
    %c0_i32 = arith.constant 0 : i32
    %c0_i32_0 = arith.constant 0 : i32
    %c0_i32_1 = arith.constant 0 : i32
    return %arg0, %arg1, %c0_i32, %c0_i32_0 : i32, i32, i32, i32
  }
}

</mosaic_0001>

<bundles_post_ra>
// kernel: conv1x1.1
= control target key start
LH: loop header
LB: loop body
LE: loop exit
PB: predicated region body
PF: predicated region fallthrough
CT: control target
= control target key end

     0   :  { %8 = vsyncpa [#allocation3], 0  ;;  %s1044_s0 = inlined_call_operand.hbm [shape: bf16[2,8,8,27], index: 0, kind: input, shape index: {}]   ;;  %s1045_s1 = inlined_call_operand.hbm [shape: bf16[27,64], index: 1, kind: input, shape index: {}]   ;;  %s1046_s2 = inlined_call_operand.vmem [shape: f32[1,64], index: 2, kind: input, shape index: {}]   ;;  %s1047_s3 = inlined_call_operand.hbm [shape: bf16[2,8,8,64], index: 3, kind: output, shape index: {}]  }
   0x1   :  { %10 = vsyncpa [#allocation3 + $0x1], 0 }
   0x2   :  { %11 = vsyncpa [#allocation6], 0 }
   0x3   :  { %12 = vsyncpa [#allocation4], 0 }
   0x4   :  { %14 = vsyncpa [#allocation4 + $0x1], 0  ;;  %s800_s12 = smov 0   ;;  %s802_s13 = smov 0  }
   0x5   :  { %s804_s14 = smov 0   ;;  %s806_s15 = smov 0  }
   0x6   :  { %s808_s16 = smov 0   ;;  %s810_s17 = smov 0  }
   0x7 LB: > { %s490_s18 = sadd.s32 4294967295, %s770_s17   ;;  %s491_s19 = sadd.s32 4294967294, %s770_s17   ;;  %s770_s17 = sphi %s810_s17, %s20_s17   ;;  %s766_s16 = sphi %s808_s16, %s1071_s16   ;;  %s762_s15 = sphi %s806_s15, %s1070_s15   ;;  %s758_s14 = sphi %s804_s14, %s1069_s14   ;;  %s754_s13 = sphi %s802_s13, %s1068_s13   ;;  %s750_s12 = sphi %s800_s12, %s1067_s12  }
   0x8   : > { %p54_p0 = scmp.ne.s32.totalorder %s754_s13, %s750_s12  ;;  %p834_p1 = scmp.eq.s32.totalorder %s490_s18, 0 }
   0x9   : > { %p838_p2 = scmp.eq.s32.totalorder %s490_s18, 1  ;;  %p128_p3 = scmp.eq.s32.totalorder %s491_s19, 1 }
   0xa   : > { %s1052_s20 = scalar_select %p834_p1, 1, 0 }
   0xb   : > { %s1053_s21 = scalar_select %p838_p2, 1, 0 }
   0xc   : > { %p844_p4 = por %p834_p1, %p54_p0  ;;  %p492_p5 = scmp.ge.s32.totalorder %s770_s17, 1 }
   0xd   : > { %p849_p6 = por %p128_p3, %p54_p0  ;;  %p135_p7 = scmp.lt.s32.totalorder %s770_s17, 3 }
   0xe   : > { %s1054_s22 = scalar_select %p844_p4, 1, 0 }
   0xf   : > { %s1055_s23 = scalar_select %p849_p6, 1, 0 }
  0x10   : > { %p854_p8 = pnand %p492_p5, %p135_p7  ;;  %s772_s25 = smov [#allocation5]  }
  0x11   : > { %s147_s26 = sshll.u32 %s772_s25, 4  ;;  %s32_s28 = sadd.s32 1, %s766_s16  ;;  %s148_s26 = int_to_ptr.vmem [resolvable:$true] %s147_s26 }
  0x12   : > { %s1056_s24 = scalar_select %p854_p8, 1, 0 }
  0x13   : > { %p550_p9 = pneg %p854_p8  ;;  %s626_s4 = scalar_lea.hbm %s1045_s1, 256 }
  0x14   : > { %p627_p12 = scmp.ne.s32.totalorder %s1045_s1, %s626_s4  ;;  %p633_p5 = scmp.lt.u32.totalorder %s626_s4, %s1045_s1 }
  0x15   : > { %p863_p11 = pnand %p550_p9, %p834_p1 }
  0x17   : > { %p628_p13 = pneg %p863_p11 }
  0x19   : > { %p629_p0 = pnand %p628_p13, %p627_p12 }
  0x1b   : > { %p630_p3 = pneg %p629_p0 }
  0x1d   : > { %p635_p7 = pnand %p633_p5, %p630_p3 }
  0x1f   : > { %638 = shalt.err (!%p635_p7)
}
  0x20   : > { %s639_s9 = scalar_lea.vmem %s148_s26, 256  ;;  %p647_p1 = scmp.lt.s32.totalorder %s148_s26, %s148_s26 }
  0x21   : > { %p640_p9 = scmp.ne.s32.totalorder %s148_s26, %s639_s9  ;;  %p648_p4 = scmp.lt.s32.totalorder %s639_s9, %s639_s9 }
  0x23   : > { %p642_p10 = pnand %p640_p9, %p628_p13  ;;  %p649_p8 = por %p648_p4, %p647_p1 }
  0x25   : > { %p643_p6 = pneg %p642_p10 }
  0x27   : > { %p650_p2 = pnand %p649_p8, %p643_p6 }
  0x29   : > { %653 = shalt.err (!%p650_p2)
}
  0x2a   : > { %s773_s10 = smov 64   ;;  %s774_s11 = smov 4  }
  0x2b   : > { %553 = dma.hbm_to_vmem [thread:$0]  (!%p863_p11), %s1045_s1, 256, %s148_s26, [#allocation6], %s773_s10, %s773_s10, %s774_s11  }
  0x2c   : > { %p34_p1 = scmp.ge.s32.totalorder %s32_s28, 2  ;;  %s41_s25 = sadd.s32 1, %s758_s14 }
  0x2d   : > { %p48_p2 = scmp.ne.s32.totalorder %s758_s14, %s754_s13  ;;  %p49_p4 = scmp.eq.s32.totalorder %s770_s17, 0 }
  0x2e   : > { %s1073_s28 = smov (%p34_p1, %s32_s28), 0  ;;  %p1059_p8 = scmp.ne.s32.totalorder %s1053_s21, 0 }
  0x2f   : > { %p893_p6 = por %p49_p4, %p48_p2  ;;  %s36_s30 = ssub.s32 %s766_s16, %s1073_s28 }
  0x30   : > { %p899_p10 = por %p1059_p8, %p48_p2  ;;  %p563_p12 = scmp.lt.s32.totalorder %s770_s17, 2 }
  0x31   : > { %p39_p11 = scmp.eq.s32.totalorder %s36_s30, 0  ;;  %s164_s26 = sand.u32 1, %s758_s14  }
  0x32   : > { %s495_s4 = sshll.u32 %s164_s26, 5  ;;  %s518_s6 = sshll.u32 %s766_s16, 9 }
  0x33   : > { %s908_s5 = scalar_select %p39_p11, %s758_s14, %s41_s25  }
  0x34   : > { %s914_s9 = scalar_lea.hbm %s1044_s0, %s518_s6  ;;  %s168_s21 = scalar_lea.vmem [#allocation2], %s495_s4 }
  0x35   : > { %s177_s18 = sshll.u32 %s168_s21, 4  ;;  %p920_p13 = pnand %p563_p12, %p893_p6  ;;  %s916_s18 = int_to_ptr.vmem [resolvable:$true] %s177_s18 }
  0x36   : > { %s924_s25 = scalar_lea.sflag [#allocation3], %s164_s26  ;;  %s654_s30 = scalar_lea.hbm %s914_s9, 512 }
  0x37   : > { %p655_p0 = scmp.ne.s32.totalorder %s914_s9, %s654_s30  ;;  %p656_p3 = pneg %p920_p13 }
  0x38   : > { %s659_s29 = scalar_lea.hbm %s1044_s0, 1024  ;;  %p660_p9 = scmp.lt.u32.totalorder %s914_s9, %s1044_s0 }
  0x39   : > { %p657_p5 = pnand %p656_p3, %p655_p0  ;;  %p661_p1 = scmp.lt.u32.totalorder %s659_s29, %s654_s30 }
  0x3a   : > { %p663_p4 = scmp.lt.u32.totalorder %s654_s30, %s914_s9 }
  0x3b   : > { %p658_p7 = pneg %p657_p5  ;;  %p662_p2 = por %p661_p1, %p660_p9 }
  0x3d   : > { %p664_p6 = por %p663_p4, %p662_p2 }
  0x3f   : > { %p665_p8 = pnand %p664_p6, %p658_p7 }
  0x41   : > { %668 = shalt.err (!%p665_p8)
}
  0x42   : > { %s669_s26 = scalar_lea.vmem %s916_s18, 512  ;;  %s775_s21 = smov [#allocation2]  }
  0x43   : > { %p670_p12 = scmp.ne.s32.totalorder %s916_s18, %s669_s26  ;;  %s674_s4 = sshll.u32 %s775_s21, 4  ;;  %s675_s4 = int_to_ptr.vmem [resolvable:$false] %s674_s4 }
  0x44   : > { %s676_s6 = scalar_lea.vmem %s675_s4, 1024  ;;  %p677_p5 = scmp.lt.s32.totalorder %s916_s18, %s675_s4 }
  0x45   : > { %p672_p11 = pnand %p670_p12, %p656_p3  ;;  %p678_p9 = scmp.lt.s32.totalorder %s676_s6, %s669_s26 }
  0x47   : > { %p673_p0 = pneg %p672_p11  ;;  %p679_p1 = por %p678_p9, %p677_p5 }
  0x49   : > { %p680_p2 = pnand %p679_p1, %p673_p0 }
  0x4b   : > { %683 = shalt.err (!%p680_p2)
}
  0x4c   : > { %557 = dma.hbm_to_vmem [thread:$0]  (!%p920_p13), %s914_s9, 512, %s916_s18, %s924_s25, %s773_s10, %s773_s10, %s774_s11  }
  0x4d   : > { %p1062_p3 = scmp.ne.s32.totalorder %s1056_s24, 0 }
  0x4e   : > { %s958_s30 = sand.u32 (!%p1062_p3), 1, %s754_s13   ;;  %p1063_p7 = scmp.ne.s32.totalorder (!%p1062_p3), %s1054_s22, 0 }
  0x4f   : > { %189 = sbr.rel (%p1062_p3) target bundleno = 334 (0x14e), region = 32  ;;  %s499_s29 = sshll.u32 (!%p1062_p3), %s958_s30, 5 }
  0x50   : > { %s192_s7 = scalar_lea.sflag (!%p1062_p3), [#allocation3], %s958_s30  ;;  %s195_s19 = scalar_lea.vmem (!%p1062_p3), [#allocation2], %s499_s29 }
  0x56   : > { %737 = dma.done.wait (%p1063_p7), %s192_s7, 512  }
  0x57   : > { %739 = vsyncadd (%p1063_p7), %s192_s7, 4294966784  ;;  %p1064_p13 = scmp.ne.s32.totalorder %s1052_s20, 0 }
  0x59   : > { %741 = dma.done.wait (%p1064_p13), [#allocation6], 256  }
  0x5a   : > { %743 = vsyncadd (%p1064_p13), [#allocation6], 4294967040  ;;  %vm288_vm0 = vcmask 1044480   ;;  %vm289_vm1 = vcmask 1045504   ;;  %v776_v0 = vmov 65535   ;;  %vm275_vm2 = vcmask 220160  }
  0x5b   : > { %v290_v1 = vsel %vm288_vm0, 4294967295, %v776_v0  ;;  %v620_v2 = vld [vmem:[#allocation5] sm:$0xff]   ;;  %v621_v4 = vld [vmem:[#allocation5 + $0x8] sm:$0x3f]   ;;  %v623_v7 = vld [vmem:[%s195_s19 + $0x10] sm:$0xff]   ;;  %vm368_vm3 = vcmask 519168  }
  0x5c   : > { %v291_v3 = vsel %vm289_vm1, %v290_v1, 0  ;;  %526 = vmatprep.subr.bf16.mxu0 %v620_v2  ;;  %538 = vmatprep.subr.bf16.mxu1 %v620_v2  ;;  %v622_v5 = vld [vmem:[%s195_s19] sm:$0xff]   ;;  %v624_v8 = vld [vmem:[%s195_s19 + $0x8] sm:$0xff]   ;;  %v625_v9 = vld [vmem:[%s195_s19 + $0x18] sm:$0xff]   ;;  %s519_s24 = sshll.u32 %s762_s15, 9  ;;  %s221_s10 = scalar_lea.vmem [#allocation7], %s499_s29 }
  0x5d   : > { %527 = vmatpush3.bf16.msra.mxu0 %v620_v2  ;;  %540 = vmatpush3.bf16.msra.mxu1 %v620_v2  ;;  %v293_v6 = vand.u32 %v621_v4, %v291_v3  ;;  %v502_v10 = vld [vmem:[%s1046_s2] ss:$0 sm:$0xff]  ;;  %s393_s11 = sshll.u32 %s221_s10, 4  ;;  %s987_s18 = scalar_lea.hbm %s1047_s3, %s519_s24  ;;  %s989_s11 = int_to_ptr.vmem [resolvable:$true] %s393_s11 }
  0x5e   : > { %530 = vmatprep.mubr.msk.bf16.mxu0 %vm275_vm2, %v622_v5  ;;  %534 = vmatprep.mubr.msk.bf16.mxu1 %vm275_vm2, %v623_v7  ;;  %s378_s25 = scalar_lea.sflag [#allocation4], %s958_s30  ;;  %s684_s8 = scalar_lea.vmem %s989_s11, 512 }
  0x5f   : > { %528 = vmatprep.subr.bf16.mxu0 %v293_v6  ;;  %539 = vmatprep.subr.bf16.mxu1 %v293_v6  ;;  %p685_p4 = scmp.ne.s32.totalorder %s989_s11, %s684_s8  ;;  %s777_s26 = smov [#allocation7]  }
  0x60   : > { %s688_s21 = sshll.u32 %s777_s26, 4  ;;  %s689_s21 = int_to_ptr.vmem [resolvable:$false] %s688_s21 }
  0x61   : > { %529 = vmatpush3.bf16.msra.mxu0 %v293_v6  ;;  %541 = vmatpush3.bf16.msra.mxu1 %v293_v6  ;;  %p686_p6 = pnand %p685_p4, %p899_p10  ;;  %s690_s4 = scalar_lea.vmem %s689_s21, 1024 }
  0x62   : > { %p691_p12 = scmp.lt.s32.totalorder %s989_s11, %s689_s21  ;;  %p692_p11 = scmp.lt.s32.totalorder %s690_s4, %s684_s8 }
  0x63   : > { %p687_p8 = pneg %p686_p6 }
  0x64   : > { %531 = vmatmul.mubr.msk.bf16.vlgmr.msra.gmra.mrb[0].mxu0 %vm275_vm2, %v624_v8  ;;  %535 = vmatmul.mubr.msk.bf16.vlgmr.msra.gmra.mrb[0].mxu1 %vm275_vm2, %v625_v9  ;;  %p693_p0 = por %p692_p11, %p691_p12 }
  0x66   : > { %p694_p5 = pnand %p693_p0, %p687_p8 }
 0x137   : > { %v532_v11 = vpop.f32.mrb[0].mxu0  ;;  %v536_v12 = vpop.f32.mrb[0].mxu1 }
 0x138   : > { %v338_v13 = vadd.f32 %v532_v11, %v502_v10  ;;  %v354_v14 = vadd.f32 %v536_v12, %v502_v10  ;;  %v329_v15 = vpop.f32.mrb[1].mxu0  ;;  %v345_v16 = vpop.f32.mrb[1].mxu1 }
 0x139   : > { %v330_v17 = vadd.f32 %v502_v10, %v329_v15  ;;  %v346_v18 = vadd.f32 %v502_v10, %v345_v16  ;;  %v533_v19 = vpop.f32.mrb[2].mxu0  ;;  %v537_v20 = vpop.f32.mrb[2].mxu1 }
 0x13a   : > { %v362_v21 = vpack.c.bf16 %v338_v13, %v338_v13  ;;  %v366_v22 = vpack.c.bf16 %v354_v14, %v354_v14  ;;  %v341_v23 = vadd.f32 %v533_v19, %v502_v10  ;;  %v357_v24 = vadd.f32 %v537_v20, %v502_v10  ;;  %v332_v25 = vpop.f32.mrb[3].mxu0  ;;  %v348_v26 = vpop.f32.mrb[3].mxu1 }
 0x13b   : > { %v360_v27 = vpack.c.bf16 %v330_v17, %v330_v17  ;;  %v364_v28 = vpack.c.bf16 %v346_v18, %v346_v18  ;;  %v333_v29 = vadd.f32 %v502_v10, %v332_v25  ;;  %v349_v30 = vadd.f32 %v502_v10, %v348_v26 }
 0x13c   : > { %371 = vst.msk [vmem:[%s221_s10 + $0x8] sm:$0xf] %vm368_vm3, %v362_v21  ;;  %375 = vst.msk [vmem:[%s221_s10 + $0x18] sm:$0xf] %vm368_vm3, %v366_v22  ;;  %v363_v31 = vpack.c.bf16 %v341_v23, %v341_v23  ;;  %v367_v32 = vpack.c.bf16 %v357_v24, %v357_v24 }
 0x13d   : > { %369 = vst.msk [vmem:[%s221_s10] sm:$0xf] %vm368_vm3, %v360_v27  ;;  %373 = vst.msk [vmem:[%s221_s10 + $0x10] sm:$0xf] %vm368_vm3, %v364_v28  ;;  %v361_v33 = vpack.c.bf16 %v333_v29, %v333_v29  ;;  %v365_v34 = vpack.c.bf16 %v349_v30, %v349_v30 }
 0x13e   : > { %372 = vst.msk [vmem:[%s221_s10 + $0xc] sm:$0xf] %vm368_vm3, %v363_v31  ;;  %376 = vst.msk [vmem:[%s221_s10 + $0x1c] sm:$0xf] %vm368_vm3, %v367_v32 }
 0x13f   : > { %370 = vst.msk [vmem:[%s221_s10 + $0x4] sm:$0xf] %vm368_vm3, %v361_v33  ;;  %374 = vst.msk [vmem:[%s221_s10 + $0x14] sm:$0xf] %vm368_vm3, %v365_v34 }
 0x140   : > { %697 = shalt.err (!%p694_p5)
}
 0x141   : > { %s698_s6 = scalar_lea.hbm %s987_s18, 512  ;;  %s702_s19 = scalar_lea.hbm %s1047_s3, 1024 }
 0x142   : > { %p699_p9 = scmp.ne.s32.totalorder %s987_s18, %s698_s6  ;;  %p703_p3 = scmp.lt.u32.totalorder %s987_s18, %s1047_s3 }
 0x143   : > { %p704_p7 = scmp.lt.u32.totalorder %s702_s19, %s698_s6  ;;  %p706_p4 = scmp.lt.u32.totalorder %s698_s6, %s987_s18 }
 0x144   : > { %p700_p1 = pnand %p699_p9, %p899_p10 }
 0x145   : > { %p705_p13 = por %p704_p7, %p703_p3 }
 0x146   : > { %p701_p2 = pneg %p700_p1 }
 0x147   : > { %p707_p6 = por %p706_p4, %p705_p13 }
 0x149   : > { %p708_p8 = pnand %p707_p6, %p701_p2 }
 0x14b   : > { %711 = shalt.err (!%p708_p8)
}
 0x14c   : > { %s778_s24 = smov 64   ;;  %s779_s10 = smov 4  }
 0x14d   : > { %548 = dma.vmem_to_hbm [thread:$0]  (%p899_p10), %s989_s11, 512, %s987_s18, %s378_s25, %s778_s24, %s778_s24, %s779_s10  }
 0x14e PF: > { %s408_s15 = sand.u32 1, %s750_s12   ;;  %p1065_p12 = scmp.ne.s32.totalorder %s1055_s23, 0 }
 0x14f   : > { %p1066_p11 = scmp.ge.s32.totalorder %s770_s17, 2  ;;  %s409_s9 = scalar_lea.sflag [#allocation4], %s408_s15 }
 0x151   : > { %p559_p0 = pnand %p1066_p11, %p1065_p12 }
 0x153   : > { %745 = dma.done.wait (!%p559_p0), %s409_s9, 512  }
 0x154   : > { %747 = vsyncadd (!%p559_p0), %s409_s9, 4294966784  ;;  %s20_s17 = sadd.s32 1, %s770_s17   ;;  %s1067_s12 = smov %s754_s13 }
 0x155   : > { %p17_p5 = scmp.ge.s32.totalorder %s20_s17, 4   ;;  %s1068_s13 = smov %s758_s14 }
 0x156   : > { %s1069_s14 = smov %s908_s5  ;;  %s1070_s15 = smov %s766_s16 }
 0x157   : > { %s1071_s16 = smov %s1073_s28  ;;  %19 = sbr.rel (!%p17_p5) target bundleno = 7 (0x7), region = 81 }
 0x15e   :  { %414 = vsyncpa [#allocation3], 1 }
 0x15f   :  { %416 = vsyncpa [#allocation3 + $0x1], 1 }
 0x160   :  { %417 = vsyncpa [#allocation6], 1 }
 0x161   :  { %418 = vsyncpa [#allocation4], 1 }
 0x162   :  { %420 = vsyncpa [#allocation4 + $0x1], 1 }

</bundles_post_ra>
